<compile_context>
chip_gen: v6e
topology: v6e:2x2x1
jax: 0.10.0
libtpu: 0.0.40
codegen_flags: <defaults>
</compile_context>

<pallas_src>
import jax
import jax.numpy as jnp
from jax.experimental import pallas as pl
from jax.experimental.pallas import tpu as pltpu


def _embedding_kernel(idx_ref, emb_ref, out_ref):
    # idx_ref: (R, G) int32   -- G packed lookups per output row
    # emb_ref: (E, D)         -- full embedding table, resident in VMEM
    # out_ref: (R, G*D)       -- lane-dense gathered rows
    r, g = idx_ref.shape
    e, d = emb_ref.shape
    emb = emb_ref[...]
    idx = idx_ref[...]                                        # (R, G)
    col = jax.lax.broadcasted_iota(jnp.int32, (r, e), 1)      # (R, E), value = e
    for q in range(g):                                        # static unroll (G small)
        onehot = (col == idx[:, q:q + 1]).astype(emb.dtype)   # (R, E) exact one-hot
        piece = jnp.dot(onehot, emb, preferred_element_type=jnp.float32)
        out_ref[:, q * d:(q + 1) * d] = piece.astype(out_ref.dtype)


def _round_up(x, m):
    return ((x + m - 1) // m) * m


def decoder_forward(encoding_indices, embedding_table, *, tile_rows=256):
    """Pallas equivalent of Decoder.forward(encoding_indices)."""
    e, d = embedding_table.shape
    orig_shape = encoding_indices.shape
    flat = encoding_indices.reshape(-1).astype(jnp.int32)
    n = flat.shape[0]

    # Pack G consecutive lookups per output row so the output lane width is a
    # multiple of 128 (falls back to G=1 when D >= 128 or D doesn't divide 128).
    g = 128 // d if (d < 128 and 128 % d == 0) else 1

    n_rows_needed = max(1, -(-n // g))
    # Keep tile_rows a multiple of 8; shrink it so tiny inputs run in 1 grid step.
    tile_rows = max(8, min(tile_rows, _round_up(n_rows_needed, 8)))
    n_rows = _round_up(n_rows_needed, tile_rows)
    n_pad = n_rows * g
    flat = jnp.pad(flat, (0, n_pad - n))          # pad with index 0 (a valid row)
    idx2d = flat.reshape(n_rows, g)

    out = pl.pallas_call(
        _embedding_kernel,
        out_shape=jax.ShapeDtypeStruct((n_rows, g * d), embedding_table.dtype),
        grid_spec=pltpu.PrefetchScalarGridSpec(
            num_scalar_prefetch=0,
            grid=(n_rows // tile_rows,),
            in_specs=[
                # One 4-KiB-ish index DMA per 1024 lookups (not per 8).
                pl.BlockSpec((tile_rows, g), lambda i: (i, 0)),
                # Full table, constant block index -> DMA'd into VMEM once.
                pl.BlockSpec((e, d), lambda i: (0, 0)),
            ],
            out_specs=pl.BlockSpec((tile_rows, g * d), lambda i: (i, 0)),
        ),
        compiler_params=pltpu.CompilerParams(
            dimension_semantics=("parallel",),      # shards over both TCs on v7x
            vmem_limit_bytes=32 * 1024 * 1024,      # explicit budget with headroom
        ),
    )(idx2d, embedding_table)

    # (n_rows, G*D) -> (n_pad, D) is a free row-major reshape; then unpad.
    return out.reshape(n_pad, d)[:n].reshape(orig_shape + (d,))


if __name__ == "__main__":
    num_embeddings = 64
    embedding_dim = 32

    key = jax.random.PRNGKey(0)
    k_w, k_idx = jax.random.split(key)

    # nn.Embedding weight, init uniform_(-1/num_embeddings, 1/num_embeddings)
    embedding_table = jax.random.uniform(
        k_w, (num_embeddings, embedding_dim), dtype=jnp.float32,
        minval=-1.0 / num_embeddings, maxval=1.0 / num_embeddings)

    # encoding_indices: batch=2, seq=8 integer codes (as a VQ-VAE decoder receives)
    encoding_indices = jax.random.randint(
        k_idx, (2, 8), minval=0, maxval=num_embeddings, dtype=jnp.int32)

    out = decoder_forward(encoding_indices, embedding_table)
    out = jax.block_until_ready(out)

    # reference: plain-JAX gather == torch nn.Embedding semantics
    ref = embedding_table[encoding_indices]
    assert out.shape == (2, 8, embedding_dim), out.shape
    assert out.dtype == embedding_table.dtype
    assert jnp.allclose(out, ref, atol=1e-6)
    print("KERNEL_OK")
</pallas_src>

<mosaic_0001>
module attributes {stable_mosaic.version = 11 : i64} {
  func.func @_embedding_kernel(%arg0: i32, %arg1: memref<8x4xi32, #tpu.memory_space<vmem>>, %arg2: memref<64x32xf32, #tpu.memory_space<vmem>>, %arg3: memref<8x128xf32, #tpu.memory_space<vmem>>) attributes {dimension_semantics = [#tpu.dimension_semantics<parallel>], iteration_bounds = array<i64: 1>, scalar_prefetch = 0 : i64, scratch_operands = 0 : i64, tpu.core_type = #tpu.core_type<tc>, window_params = [{transform_indices = @transform_0, window_bounds = array<i64: 8, 4>}, {pipeline_mode = #tpu.pipeline_mode<synchronous>, transform_indices = @transform_1, window_bounds = array<i64: 64, 32>}, {transform_indices = @transform_2, window_bounds = array<i64: 8, 128>}]} {
    %c0 = arith.constant 0 : index
    %c0_0 = arith.constant 0 : index
    %0 = vector.load %arg2[%c0, %c0_0] : memref<64x32xf32, #tpu.memory_space<vmem>>, vector<64x32xf32>
    %c0_1 = arith.constant 0 : index
    %c0_2 = arith.constant 0 : index
    %1 = vector.load %arg1[%c0_1, %c0_2] : memref<8x4xi32, #tpu.memory_space<vmem>>, vector<8x4xi32>
    %2 = tpu.iota {dimensions = array<i32: 1>} : vector<8x64xi32>
    %3 = vector.extract_strided_slice %1 {offsets = [0, 0], sizes = [8, 1], strides = [1, 1]} : vector<8x4xi32> to vector<8x1xi32>
    %4 = vector.broadcast %3 : vector<8x1xi32> to vector<8x64xi32>
    %5 = arith.cmpi eq, %2, %4 : vector<8x64xi32>
    %6 = arith.extui %5 : vector<8x64xi1> to vector<8x64xi32>
    %7 = arith.sitofp %6 : vector<8x64xi32> to vector<8x64xf32>
    %cst = arith.constant dense<0.000000e+00> : vector<8x32xf32>
    %8 = tpu.matmul %7, %0, %cst {dimension_numbers = #tpu.dot_dimension_numbers<[1], [0], [0], [1], [0, 0, 1, 1], [], []>} : vector<8x64xf32>, vector<64x32xf32>, vector<8x32xf32> -> vector<8x32xf32>
    %c0_3 = arith.constant 0 : index
    %c0_4 = arith.constant 0 : index
    %9 = vector.load %arg3[%c0_3, %c0_4] : memref<8x128xf32, #tpu.memory_space<vmem>>, vector<8x32xf32>
    tpu.vector_store %arg3[%c0_3, %c0_4], %8 {strides = array<i32>} : memref<8x128xf32, #tpu.memory_space<vmem>>, vector<8x32xf32>,
    %10 = vector.extract_strided_slice %1 {offsets = [0, 1], sizes = [8, 1], strides = [1, 1]} : vector<8x4xi32> to vector<8x1xi32>
    %11 = vector.broadcast %10 : vector<8x1xi32> to vector<8x64xi32>
    %12 = arith.cmpi eq, %2, %11 : vector<8x64xi32>
    %13 = arith.extui %12 : vector<8x64xi1> to vector<8x64xi32>
    %14 = arith.sitofp %13 : vector<8x64xi32> to vector<8x64xf32>
    %cst_5 = arith.constant dense<0.000000e+00> : vector<8x32xf32>
    %15 = tpu.matmul %14, %0, %cst_5 {dimension_numbers = #tpu.dot_dimension_numbers<[1], [0], [0], [1], [0, 0, 1, 1], [], []>} : vector<8x64xf32>, vector<64x32xf32>, vector<8x32xf32> -> vector<8x32xf32>
    %c0_6 = arith.constant 0 : index
    %c32 = arith.constant 32 : index
    %16 = vector.load %arg3[%c0_6, %c32] : memref<8x128xf32, #tpu.memory_space<vmem>>, vector<8x32xf32>
    tpu.vector_store %arg3[%c0_6, %c32], %15 {strides = array<i32>} : memref<8x128xf32, #tpu.memory_space<vmem>>, vector<8x32xf32>,
    %17 = vector.extract_strided_slice %1 {offsets = [0, 2], sizes = [8, 1], strides = [1, 1]} : vector<8x4xi32> to vector<8x1xi32>
    %18 = vector.broadcast %17 : vector<8x1xi32> to vector<8x64xi32>
    %19 = arith.cmpi eq, %2, %18 : vector<8x64xi32>
    %20 = arith.extui %19 : vector<8x64xi1> to vector<8x64xi32>
    %21 = arith.sitofp %20 : vector<8x64xi32> to vector<8x64xf32>
    %cst_7 = arith.constant dense<0.000000e+00> : vector<8x32xf32>
    %22 = tpu.matmul %21, %0, %cst_7 {dimension_numbers = #tpu.dot_dimension_numbers<[1], [0], [0], [1], [0, 0, 1, 1], [], []>} : vector<8x64xf32>, vector<64x32xf32>, vector<8x32xf32> -> vector<8x32xf32>
    %c0_8 = arith.constant 0 : index
    %c64 = arith.constant 64 : index
    %23 = vector.load %arg3[%c0_8, %c64] : memref<8x128xf32, #tpu.memory_space<vmem>>, vector<8x32xf32>
    tpu.vector_store %arg3[%c0_8, %c64], %22 {strides = array<i32>} : memref<8x128xf32, #tpu.memory_space<vmem>>, vector<8x32xf32>,
    %24 = vector.extract_strided_slice %1 {offsets = [0, 3], sizes = [8, 1], strides = [1, 1]} : vector<8x4xi32> to vector<8x1xi32>
    %25 = vector.broadcast %24 : vector<8x1xi32> to vector<8x64xi32>
    %26 = arith.cmpi eq, %2, %25 : vector<8x64xi32>
    %27 = arith.extui %26 : vector<8x64xi1> to vector<8x64xi32>
    %28 = arith.sitofp %27 : vector<8x64xi32> to vector<8x64xf32>
    %cst_9 = arith.constant dense<0.000000e+00> : vector<8x32xf32>
    %29 = tpu.matmul %28, %0, %cst_9 {dimension_numbers = #tpu.dot_dimension_numbers<[1], [0], [0], [1], [0, 0, 1, 1], [], []>} : vector<8x64xf32>, vector<64x32xf32>, vector<8x32xf32> -> vector<8x32xf32>
    %c0_10 = arith.constant 0 : index
    %c96 = arith.constant 96 : index
    %30 = vector.load %arg3[%c0_10, %c96] : memref<8x128xf32, #tpu.memory_space<vmem>>, vector<8x32xf32>
    tpu.vector_store %arg3[%c0_10, %c96], %29 {strides = array<i32>} : memref<8x128xf32, #tpu.memory_space<vmem>>, vector<8x32xf32>,
    return
  }
  func.func @transform_0(%arg0: i32) -> (i32, i32) {
    %c0_i32 = arith.constant 0 : i32
    %c0_i32_0 = arith.constant 0 : i32
    return %arg0, %c0_i32 : i32, i32
  }
  func.func @transform_1(%arg0: i32) -> (i32, i32) {
    %c0_i32 = arith.constant 0 : i32
    %c0_i32_0 = arith.constant 0 : i32
    %c0_i32_1 = arith.constant 0 : i32
    return %c0_i32, %c0_i32_0 : i32, i32
  }
  func.func @transform_2(%arg0: i32) -> (i32, i32) {
    %c0_i32 = arith.constant 0 : i32
    %c0_i32_0 = arith.constant 0 : i32
    return %arg0, %c0_i32 : i32, i32
  }
}

</mosaic_0001>

<bundles_post_ra>
// kernel: tpu_custom_call.1
= control target key start
LH: loop header
LB: loop body
LE: loop exit
PB: predicated region body
PF: predicated region fallthrough
CT: control target
= control target key end

     0   :  { %v531_v1 = vmov 0   ;;  %v532_v2 = vmov 2   ;;  %v533_v4 = vmov 0.0   ;;  %s676_s0 = inlined_call_operand.vmem [shape: s32[8,4], index: 0, kind: input, shape index: {}]   ;;  %s677_s1 = inlined_call_operand.vmem [shape: f32[64,32], index: 1, kind: input, shape index: {}]   ;;  %s678_s2 = inlined_call_operand.hbm [shape: f32[8,128], index: 2, kind: output, shape index: {}]  }
   0x1   :  { %v20_v0 = vld [vmem:[%s676_s0] sm:$0xff]  ;;  %504 = vset.pattern.permute.xlu0 %v531_v1  ;;  %506 = vset.pattern.permute.xlu1 %v532_v2  ;;  %v562_v3 = vld [vmem:[%s677_s1 + $0x38] sm:$0xff] }
   0x2   :  { %24 = vperm.xlu0 %504, %v20_v0   ;;  %191 = vperm.xlu1 %506, %v20_v0  }
   0x3   :  { %418 = vmatprep.subr.mxu0 %v533_v4  ;;  %437 = vmatprep.subr.mxu1 %v533_v4 }
   0x4   :  { %7 = vsyncpa [#allocation3], 0  ;;  %419 = vmatpush3.msra.mxu0 %v562_v3  ;;  %438 = vmatpush3.msra.mxu1 %v562_v3  ;;  %v572_v5 = vld [vmem:[%s677_s1 + $0x30] sm:$0xff]  ;;  %v534_v6 = vmov 1   ;;  %v535_v7 = vmov 3   ;;  %v578_v8 = vld [vmem:[%s677_s1 + $0x28] sm:$0xff]  ;;  %v21_v14 = vlaneseq }
   0x5   :  { %420 = vmatprep.subr.mxu0 %v533_v4  ;;  %439 = vmatprep.subr.mxu1 %v533_v4  ;;  %v586_v9 = vld [vmem:[%s677_s1 + $0x20] sm:$0xff]  ;;  %v595_v10 = vld [vmem:[%s677_s1 + $0x18] sm:$0xff]  ;;  %v604_v11 = vld [vmem:[%s677_s1 + $0x10] sm:$0xff]  ;;  %vm536_vm0 = vmmov 0   ;;  %vm29_vm1 = vcmask 523264   ;;  %vm103_vm6 = vcmask 261120  }
   0x6   :  { %505 = vset.pattern.permute.xlu0 %v534_v6  ;;  %507 = vset.pattern.permute.xlu1 %v535_v7  ;;  %v613_v12 = vld [vmem:[%s677_s1 + $0x8] sm:$0xff]  ;;  %v12_v13 = vld [vmem:[%s677_s1] sm:$0xff]  ;;  %v22_v15 = vand.u32 127, %v21_v14  ;;  %s537_s1 = smov 32   ;;  %s538_s26 = smov 64   ;;  %vm188_vm7 = vcmask 523520  }
   0x7   :  { %106 = vperm.xlu0 %505, %v20_v0   ;;  %276 = vperm.xlu1 %507, %v20_v0   ;;  %s539_s27 = smov 96   ;;  %vm273_vm8 = vcmask 785920   ;;  %s540_s28 = smov [#allocation2]   ;;  %vm358_vm9 = vcmask 1048320  }
   0x8   :  { %421 = vmatpush3.msra.mxu0 %v572_v5  ;;  %440 = vmatpush3.msra.mxu1 %v572_v5  ;;  %s366_s29 = sshll.u32 %s540_s28, 4  ;;  %s367_s29 = int_to_ptr.vmem [resolvable:$true] %s366_s29 }
   0x9   :  { %422 = vmatprep.subr.mxu0 %v533_v4  ;;  %441 = vmatprep.subr.mxu1 %v533_v4  ;;  %s509_s30 = scalar_lea.vmem %s367_s29, 128  ;;  %p514_p1 = scmp.lt.s32.totalorder %s367_s29, %s367_s29 }
   0xa   :  { %423 = vmatpush3.msra.mxu0 %v578_v8  ;;  %442 = vmatpush3.msra.mxu1 %v578_v8  ;;  %p510_p0 = scmp.ne.s32.totalorder %s367_s29, %s509_s30  ;;  %p515_p2 = scmp.lt.s32.totalorder %s509_s30, %s509_s30 }
   0xb   :  { %424 = vmatprep.subr.mxu0 %v533_v4  ;;  %443 = vmatprep.subr.mxu1 %v533_v4 }
   0xc   :  { %425 = vmatpush3.msra.mxu0 %v586_v9  ;;  %444 = vmatpush3.msra.mxu1 %v586_v9  ;;  %p516_p3 = por %p515_p2, %p514_p1 }
   0xd   :  { %426 = vmatprep.subr.mxu0 %v533_v4  ;;  %445 = vmatprep.subr.mxu1 %v533_v4 }
   0xe   :  { %427 = vmatpush3.msra.mxu0 %v595_v10  ;;  %446 = vmatpush3.msra.mxu1 %v595_v10  ;;  %p517_p4 = pnand %p516_p3, %p510_p0 }
   0xf   :  { %428 = vmatprep.subr.mxu0 %v533_v4  ;;  %447 = vmatprep.subr.mxu1 %v533_v4 }
  0x10   :  { %429 = vmatpush3.msra.mxu0 %v604_v11  ;;  %434 = vmatprep.mubr.msk.f32.mxu0 %vm536_vm0, %v533_v4 }
  0x11   :  { %430 = vmatprep.subr.mxu0 %v533_v4  ;;  %448 = vmatpush3.msra.mxu1 %v604_v11 }
  0x12   :  { %431 = vmatpush3.msra.mxu0 %v613_v12  ;;  %449 = vmatprep.subr.mxu1 %v533_v4 }
  0x13   :  { %432 = vmatprep.subr.mxu0 %v533_v4  ;;  %450 = vmatpush3.msra.mxu1 %v613_v12 }
  0x14   :  { %433 = vmatpush3.msra.mxu0 %v12_v13  ;;  %451 = vmatprep.subr.mxu1 %v533_v4 }
  0x15   :  { %456 = vmatprep.subr.mxu0 %v533_v4  ;;  %452 = vmatpush3.msra.mxu1 %v12_v13 }
  0x16   :  { %453 = vmatprep.mubr.msk.f32.mxu1 %vm536_vm0, %v533_v4  ;;  %475 = vmatprep.subr.mxu1 %v533_v4 }
  0x17   :  { %508 = vset.pattern.permute.xlu0 %v535_v7 }
  0x7d   :  { %v25_v16 = vpop.permute.xlu0 %24  ;;  %v192_v20 = vpop.permute.xlu1 %191 }
  0x7e   :  { %vm26_vm2 = vcmp.eq.s32.totalorder %v22_v15, %v25_v16  ;;  %vm193_vm4 = vcmp.eq.s32.totalorder %v22_v15, %v192_v20 }
  0x7f   :  { %v374_v17 = vsel %vm26_vm2, 1.0, %v533_v4  ;;  %v378_v22 = vsel %vm193_vm4, 1.0, %v533_v4 }
  0x80   :  { %435 = vmatmul.mubr.msk.f32.vlgmr.msra.gmra.mxu0 %vm29_vm1, %v374_v17 }
  0x81   :  { %457 = vmatpush3.msra.mxu0 %v562_v3  ;;  %472 = vmatprep.mubr.msk.f32.mxu0 %vm536_vm0, %v533_v4 }
  0x82   :  { %458 = vmatprep.subr.mxu0 %v533_v4  ;;  %v107_v18 = vpop.permute.xlu0 %106  ;;  %v277_v21 = vpop.permute.xlu1 %276 }
  0x83   :  { %vm108_vm3 = vcmp.eq.s32.totalorder %v22_v15, %v107_v18  ;;  %459 = vmatpush3.msra.mxu0 %v572_v5  ;;  %vm278_vm5 = vcmp.eq.s32.totalorder %v22_v15, %v277_v21 }
  0x84   :  { %v376_v19 = vsel %vm108_vm3, 1.0, %v533_v4  ;;  %460 = vmatprep.subr.mxu0 %v533_v4  ;;  %v380_v23 = vsel %vm278_vm5, 1.0, %v533_v4 }
  0x85   :  { %461 = vmatpush3.msra.mxu0 %v578_v8  ;;  %454 = vmatmul.mubr.msk.f32.vlgmr.msra.gmra.mxu1 %vm29_vm1, %v376_v19 }
  0x86   :  { %462 = vmatprep.subr.mxu0 %v533_v4  ;;  %476 = vmatpush3.msra.mxu1 %v562_v3 }
  0x87   :  { %463 = vmatpush3.msra.mxu0 %v586_v9  ;;  %477 = vmatprep.subr.mxu1 %v533_v4 }
  0x88   :  { %464 = vmatprep.subr.mxu0 %v533_v4  ;;  %478 = vmatpush3.msra.mxu1 %v572_v5 }
  0x89   :  { %465 = vmatpush3.msra.mxu0 %v595_v10  ;;  %479 = vmatprep.subr.mxu1 %v533_v4 }
  0x8a   :  { %466 = vmatprep.subr.mxu0 %v533_v4  ;;  %480 = vmatpush3.msra.mxu1 %v578_v8 }
  0x8b   :  { %467 = vmatpush3.msra.mxu0 %v604_v11  ;;  %481 = vmatprep.subr.mxu1 %v533_v4 }
  0x8c   :  { %468 = vmatprep.subr.mxu0 %v533_v4  ;;  %482 = vmatpush3.msra.mxu1 %v586_v9 }
  0x8d   :  { %469 = vmatpush3.msra.mxu0 %v613_v12  ;;  %483 = vmatprep.subr.mxu1 %v533_v4 }
  0x8e   :  { %470 = vmatprep.subr.mxu0 %v533_v4  ;;  %484 = vmatpush3.msra.mxu1 %v595_v10 }
  0x8f   :  { %471 = vmatpush3.msra.mxu0 %v12_v13  ;;  %485 = vmatprep.subr.mxu1 %v533_v4 }
  0x90   :  { %473 = vmatmul.mubr.msk.f32.vlgmr.msra.gmra.mxu0 %vm29_vm1, %v378_v22  ;;  %486 = vmatpush3.msra.mxu1 %v604_v11 }
  0x91   :  { %487 = vmatprep.subr.mxu1 %v533_v4  ;;  %491 = vmatprep.mubr.msk.f32.mxu1 %vm536_vm0, %v533_v4 }
  0x92   :  { %488 = vmatpush3.msra.mxu1 %v613_v12 }
  0x93   :  { %489 = vmatprep.subr.mxu1 %v533_v4 }
  0x94   :  { %490 = vmatpush3.msra.mxu1 %v12_v13 }
  0x95   :  { %492 = vmatmul.mubr.msk.f32.vlgmr.msra.gmra.mxu1 %vm29_vm1, %v380_v23 }
 0x140   :  { %v99_v24 = vpop.f32.mrf.mxu0 }
 0x141   :  { %104 = vst.msk [vmem:[#allocation2] sm:$0xff] %vm103_vm6, %v99_v24 }
 0x142   :  { %v436_v25 = vpop.f32.mrf.mxu0 }
 0x145   :  { %v180_v26 = vpop.f32.mrf.mxu1 }
 0x146   :  { %185 = vrot.lane.b32.xlu1 %v180_v26, %s537_s1 }
 0x147   :  { %v455_v27 = vpop.f32.mrf.mxu1 }
 0x150   :  { %v265_v28 = vpop.f32.mrf.mxu0 }
 0x151   :  { %270 = vrot.lane.b32.xlu0 %v265_v28, %s538_s26 }
 0x152   :  { %v474_v29 = vpop.f32.mrf.mxu0 }
 0x155   :  { %v350_v30 = vpop.f32.mrf.mxu1 }
 0x156   :  { %355 = vrot.lane.b32.xlu1 %v350_v30, %s539_s27 }
 0x157   :  { %v493_v31 = vpop.f32.mrf.mxu1 }
 0x1b8   :  { %v186_v32 = vpop.permute.xlu1 %185 }
 0x1b9   :  { %189 = vst.msk [vmem:[#allocation2] sm:$0xff] %vm188_vm7, %v186_v32 }
 0x1c3   :  { %v271_v33 = vpop.permute.xlu0 %270 }
 0x1c4   :  { %274 = vst.msk [vmem:[#allocation2] sm:$0xff] %vm273_vm8, %v271_v33 }
 0x1c8   :  { %v356_v34 = vpop.permute.xlu1 %355 }
 0x1c9   :  { %359 = vst.msk [vmem:[#allocation2] sm:$0xff] %vm358_vm9, %v356_v34 }
 0x1ca   :  { %520 = shalt.err (!%p517_p4)
}
 0x1cb   :  { %369 = dma.vmem_to_hbm [thread:$0]  %s367_s29, 128, %s678_s2, [#allocation3]  }
 0x1cc   :  { %529 = dma.done.wait [#allocation3], 128  }
 0x1cd   :  { %530 = vsyncadd [#allocation3], 4294967168 }
 0x1ce   :  { %373 = vsyncpa [#allocation3], 1 }

</bundles_post_ra>
